<compile_context>
chip_gen: v7x
topology: tpu7x:2x2x1
jax: 0.10.0
libtpu: 0.0.40
codegen_flags: <defaults>
</compile_context>

<pallas_src>
import functools

import jax
import jax.numpy as jnp
from jax.experimental import pallas as pl
from jax.experimental.pallas import tpu as pltpu


def _round_up(x, m):
    return ((x + m - 1) // m) * m


# ---------------------------------------------------------------------------
# Kernel A: fused ReLU + (im2col) conv matmul + per-tile BN partial statistics
# ---------------------------------------------------------------------------
def _relu_conv_stats_kernel(p_ref, w_ref, y_ref, ps_ref):
    # p_ref : (TM, Kp)    im2col patch tile (compute dtype; zero-padded rows/cols)
    # w_ref : (Kp, Cp)    flattened conv weight (grid-invariant -> stays resident)
    # y_ref : (TM, Cp)    f32 conv output tile (lane-dense)
    # ps_ref: (1, 2, Cp)  f32 per-tile [sum; sum of squares] over rows
    p = jnp.maximum(p_ref[...], 0.0)                       # ReLU (zero padding is ReLU-safe)
    y = jnp.dot(p, w_ref[...], preferred_element_type=jnp.float32)   # one big MXU contraction
    y_ref[...] = y
    ps = jnp.concatenate(
        [jnp.sum(y, axis=0, keepdims=True),
         jnp.sum(y * y, axis=0, keepdims=True)], axis=0)   # (2, Cp), XLU reduce
    ps_ref[0, :, :] = ps


# ---------------------------------------------------------------------------
# Kernel B: apply batch-norm as one fused multiply-add per tile
# ---------------------------------------------------------------------------
def _bn_apply_kernel(ss_ref, y_ref, o_ref):
    # ss_ref: (2, Cp)  [scale; shift] slab (grid-invariant; gamma/beta/mean/var folded in)
    # y_ref : (TM, Cp) f32 conv output tile
    # o_ref : (TM, Cp) normalized output tile (aliases the y buffer)
    o_ref[...] = y_ref[...] * ss_ref[0:1, :] + ss_ref[1:2, :]


@functools.partial(
    jax.jit,
    static_argnames=("stride", "padding", "eps", "compute_dtype", "row_tile"))
def relu_conv_bn(x_nchw, w_oihw, gamma, beta, *, stride, padding, eps=1e-5,
                 compute_dtype=jnp.float32, row_tile=256):
    """Forward of ReLUConvBN. x: NCHW f32, w: OIHW f32. Returns NCHW f32."""
    N, C_in, H, W = x_nchw.shape
    C_out, _, KH, KW = w_oihw.shape
    H_out = (H + 2 * padding - KH) // stride + 1
    W_out = (W + 2 * padding - KW) // stride + 1

    M = N * H_out * W_out
    K = KH * KW * C_in
    Kp = _round_up(K, 128)                      # lane-dense contraction dim
    Cp = _round_up(C_out, 128)                  # lane-dense output dim
    TM = min(row_tile, _round_up(M, 8))         # row tile, multiple of 8
    Mp = _round_up(M, TM)
    n_tiles = Mp // TM

    # ---- plain-JAX layout glue (fused by XLA): NCHW -> padded NHWC -> im2col ----
    x = jnp.transpose(x_nchw, (0, 2, 3, 1)).astype(jnp.float32)        # NHWC
    x = jnp.pad(x, ((0, 0), (padding, padding), (padding, padding), (0, 0)))
    taps = []
    for kh in range(KH):
        for kw in range(KW):
            taps.append(x[:,
                          kh:kh + (H_out - 1) * stride + 1:stride,
                          kw:kw + (W_out - 1) * stride + 1:stride,
                          :])
    patches = jnp.concatenate(taps, axis=-1).reshape(M, K)             # (M, KH*KW*C_in)
    patches = jnp.pad(patches, ((0, Mp - M), (0, Kp - K))).astype(compute_dtype)

    w = jnp.transpose(w_oihw, (2, 3, 1, 0)).astype(jnp.float32).reshape(K, C_out)
    w = jnp.pad(w, ((0, Kp - K), (0, Cp - C_out))).astype(compute_dtype)

    in_bytes = jnp.dtype(compute_dtype).itemsize
    cparams = pltpu.CompilerParams(
        dimension_semantics=("parallel",),                 # row tiles are independent
        vmem_limit_bytes=32 * 1024 * 1024)                 # safe on v7x (64 MiB physical)

    # ---- Kernel A: ReLU + conv + per-tile stats -------------------------------
    cost_a = pl.CostEstimate(
        flops=2 * Mp * Kp * Cp,
        transcendentals=0,
        bytes_accessed=(Mp * Kp + Kp * Cp) * in_bytes + (Mp + 2 * n_tiles) * Cp * 4)

    y, partial = pl.pallas_call(
        _relu_conv_stats_kernel,
        out_shape=(jax.ShapeDtypeStruct((Mp, Cp), jnp.float32),
                   jax.ShapeDtypeStruct((n_tiles, 2, Cp), jnp.float32)),
        grid=(n_tiles,),
        in_specs=[pl.BlockSpec((TM, Kp), lambda i: (i, 0)),
                  pl.BlockSpec((Kp, Cp), lambda i: (0, 0))],
        out_specs=(pl.BlockSpec((TM, Cp), lambda i: (i, 0)),
                   pl.BlockSpec((1, 2, Cp), lambda i: (i, 0, 0))),
        compiler_params=cparams,
        cost_estimate=cost_a,
    )(patches, w)

    # ---- tiny finalize in plain JAX: biased (training-mode) batch statistics ---
    stats = jnp.sum(partial, axis=0)                       # (2, Cp)
    mean = stats[0] / M
    var = jnp.maximum(stats[1] / M - mean * mean, 0.0)     # E[y^2] - E[y]^2, clamped
    inv_std = jax.lax.rsqrt(var + eps)
    gamma_p = jnp.pad(gamma.astype(jnp.float32), (0, Cp - C_out))
    beta_p = jnp.pad(beta.astype(jnp.float32), (0, Cp - C_out))
    scale = gamma_p * inv_std
    shift = beta_p - mean * scale
    ss = jnp.stack([scale, shift], axis=0)                 # (2, Cp) slab

    # ---- Kernel B: y * scale + shift per tile (donates y's buffer) -------------
    cost_b = pl.CostEstimate(
        flops=2 * Mp * Cp,
        transcendentals=0,
        bytes_accessed=2 * Mp * Cp * 4 + 2 * Cp * 4)

    o = pl.pallas_call(
        _bn_apply_kernel,
        out_shape=jax.ShapeDtypeStruct((Mp, Cp), jnp.float32),
        grid=(n_tiles,),
        in_specs=[pl.BlockSpec((2, Cp), lambda i: (0, 0)),
                  pl.BlockSpec((TM, Cp), lambda i: (i, 0))],
        out_specs=pl.BlockSpec((TM, Cp), lambda i: (i, 0)),
        input_output_aliases={1: 0},                       # reuse the conv-output buffer
        compiler_params=cparams,
        cost_estimate=cost_b,
    )(ss, y)

    # ---- back to NCHW (layout plumbing, fused by XLA under jit) ----------------
    out = o[:M, :C_out].reshape(N, H_out, W_out, C_out)
    return jnp.transpose(out, (0, 3, 1, 2))


def _reference(x_nchw, w_oihw, gamma, beta, *, stride, padding, eps=1e-5):
    """Pure-JAX reference: relu -> conv (no bias) -> training-mode batchnorm."""
    x = jnp.maximum(x_nchw, 0.0)
    y = jax.lax.conv_general_dilated(
        x, w_oihw,
        window_strides=(stride, stride),
        padding=[(padding, padding), (padding, padding)],
        dimension_numbers=("NCHW", "OIHW", "NCHW"),
    )
    mean = jnp.mean(y, axis=(0, 2, 3), keepdims=True)
    var = jnp.mean((y - mean) ** 2, axis=(0, 2, 3), keepdims=True)
    yhat = (y - mean) * jax.lax.rsqrt(var + eps)
    return yhat * gamma.reshape(1, -1, 1, 1) + beta.reshape(1, -1, 1, 1)


if __name__ == "__main__":

    def run_case(idx, N, C_in, C_out, H, W, ksz, stride, padding, compute_dtype, tol):
        k = jax.random.fold_in(jax.random.PRNGKey(0), idx)
        kx, kw, kg, kb = jax.random.split(k, 4)
        x = jax.random.normal(kx, (N, C_in, H, W), dtype=jnp.float32)
        w = 0.1 * jax.random.normal(kw, (C_out, C_in, ksz, ksz), dtype=jnp.float32)
        gamma = 1.0 + 0.1 * jax.random.normal(kg, (C_out,), dtype=jnp.float32)
        beta = 0.1 * jax.random.normal(kb, (C_out,), dtype=jnp.float32)

        out = relu_conv_bn(x, w, gamma, beta, stride=stride, padding=padding,
                           compute_dtype=compute_dtype)
        out = jax.block_until_ready(out)

        ref = _reference(x, w, gamma, beta, stride=stride, padding=padding)
        H_out = (H + 2 * padding - ksz) // stride + 1
        W_out = (W + 2 * padding - ksz) // stride + 1
        assert out.shape == (N, C_out, H_out, W_out), f"case {idx}: bad shape {out.shape}"
        assert jnp.allclose(out, ref, atol=tol, rtol=tol), f"case {idx}: mismatch vs reference"

    # nor_conv_3x3 (stride 1), f32 MXU inputs
    run_case(0, 2, 4, 8, 16, 16, 3, 1, 1, jnp.float32, 1e-4)
    # nor_conv_3x3 (stride 1), bf16 MXU inputs (v6e/v7x fast path), f32 BN math
    run_case(1, 2, 4, 8, 16, 16, 3, 1, 1, jnp.bfloat16, 5e-2)
    # nor_conv_1x1 / cell preprocess (1x1, stride 1, padding 0)
    run_case(2, 2, 16, 16, 16, 16, 1, 1, 0, jnp.float32, 1e-4)
    # reduction-cell nor_conv_3x3 (stride 2)
    run_case(3, 2, 8, 8, 16, 16, 3, 2, 1, jnp.float32, 1e-4)

    print("KERNEL_OK")
</pallas_src>

<mosaic_0001>
module attributes {stable_mosaic.version = 11 : i64} {
  func.func @_relu_conv_stats_kernel(%arg0: i32, %arg1: memref<256x128xf32, #tpu.memory_space<vmem>>, %arg2: memref<128x128xf32, #tpu.memory_space<vmem>>, %arg3: memref<256x128xf32, #tpu.memory_space<vmem>>, %arg4: memref<1x2x128xf32, #tpu.memory_space<vmem>>) attributes {dimension_semantics = [#tpu.dimension_semantics<parallel>], iteration_bounds = array<i64: 2>, scalar_prefetch = 0 : i64, scratch_operands = 0 : i64, tpu.core_type = #tpu.core_type<tc>, window_params = [{transform_indices = @transform_0, window_bounds = array<i64: 256, 128>}, {pipeline_mode = #tpu.pipeline_mode<synchronous>, transform_indices = @transform_1, window_bounds = array<i64: 128, 128>}, {transform_indices = @transform_2, window_bounds = array<i64: 256, 128>}, {transform_indices = @transform_3, window_bounds = array<i64: 1, 2, 128>}]} {
    %c0 = arith.constant 0 : index
    %c0_0 = arith.constant 0 : index
    %0 = vector.load %arg1[%c0, %c0_0] : memref<256x128xf32, #tpu.memory_space<vmem>>, vector<256x128xf32>
    %cst = arith.constant 0.000000e+00 : f32
    %1 = vector.broadcast %cst : f32 to vector<256x128xf32>
    %2 = arith.maximumf %0, %1 : vector<256x128xf32>
    %c0_1 = arith.constant 0 : index
    %c0_2 = arith.constant 0 : index
    %3 = vector.load %arg2[%c0_1, %c0_2] : memref<128x128xf32, #tpu.memory_space<vmem>>, vector<128x128xf32>
    %cst_3 = arith.constant dense<0.000000e+00> : vector<256x128xf32>
    %4 = tpu.matmul %2, %3, %cst_3 {dimension_numbers = #tpu.dot_dimension_numbers<[1], [0], [0], [1], [0, 0, 1, 1], [], []>} : vector<256x128xf32>, vector<128x128xf32>, vector<256x128xf32> -> vector<256x128xf32>
    %c0_4 = arith.constant 0 : index
    %c0_5 = arith.constant 0 : index
    %5 = vector.load %arg3[%c0_4, %c0_5] : memref<256x128xf32, #tpu.memory_space<vmem>>, vector<256x128xf32>
    tpu.vector_store %arg3[%c0_4, %c0_5], %4 {strides = array<i32>} : memref<256x128xf32, #tpu.memory_space<vmem>>, vector<256x128xf32>,
    %cst_6 = arith.constant dense<0.000000e+00> : vector<128xf32>
    %6 = vector.multi_reduction <add>, %4, %cst_6 [0] : vector<256x128xf32> to vector<128xf32>
    %7 = vector.shape_cast %6 : vector<128xf32> to vector<1x128xf32>
    %8 = arith.mulf %4, %4 : vector<256x128xf32>
    %cst_7 = arith.constant dense<0.000000e+00> : vector<128xf32>
    %9 = vector.multi_reduction <add>, %8, %cst_7 [0] : vector<256x128xf32> to vector<128xf32>
    %10 = vector.shape_cast %9 : vector<128xf32> to vector<1x128xf32>
    %11 = tpu.concatenate %7, %10 in 0 : vector<1x128xf32>, vector<1x128xf32> -> vector<2x128xf32>
    %c0_8 = arith.constant 0 : index
    %c0_9 = arith.constant 0 : index
    %c0_10 = arith.constant 0 : index
    %12 = vector.load %arg4[%c0_8, %c0_9, %c0_10] : memref<1x2x128xf32, #tpu.memory_space<vmem>>, vector<1x2x128xf32>
    %13 = vector.shape_cast %12 : vector<1x2x128xf32> to vector<2x128xf32>
    %14 = vector.shape_cast %11 : vector<2x128xf32> to vector<1x2x128xf32>
    tpu.vector_store %arg4[%c0_8, %c0_9, %c0_10], %14 {strides = array<i32>} : memref<1x2x128xf32, #tpu.memory_space<vmem>>, vector<1x2x128xf32>,
    return
  }
  func.func @transform_0(%arg0: i32) -> (i32, i32) {
    %c0_i32 = arith.constant 0 : i32
    %c0_i32_0 = arith.constant 0 : i32
    return %arg0, %c0_i32 : i32, i32
  }
  func.func @transform_1(%arg0: i32) -> (i32, i32) {
    %c0_i32 = arith.constant 0 : i32
    %c0_i32_0 = arith.constant 0 : i32
    %c0_i32_1 = arith.constant 0 : i32
    return %c0_i32, %c0_i32_0 : i32, i32
  }
  func.func @transform_2(%arg0: i32) -> (i32, i32) {
    %c0_i32 = arith.constant 0 : i32
    %c0_i32_0 = arith.constant 0 : i32
    return %arg0, %c0_i32 : i32, i32
  }
  func.func @transform_3(%arg0: i32) -> (i32, i32, i32) {
    %c0_i32 = arith.constant 0 : i32
    %c0_i32_0 = arith.constant 0 : i32
    %c0_i32_1 = arith.constant 0 : i32
    return %arg0, %c0_i32, %c0_i32_0 : i32, i32, i32
  }
}

module attributes {stable_mosaic.version = 11 : i64} {
  func.func @_bn_apply_kernel(%arg0: i32, %arg1: memref<2x128xf32, #tpu.memory_space<vmem>>, %arg2: memref<256x128xf32, #tpu.memory_space<vmem>>, %arg3: memref<256x128xf32, #tpu.memory_space<vmem>>) attributes {dimension_semantics = [#tpu.dimension_semantics<parallel>], iteration_bounds = array<i64: 2>, scalar_prefetch = 0 : i64, scratch_operands = 0 : i64, tpu.core_type = #tpu.core_type<tc>, window_params = [{pipeline_mode = #tpu.pipeline_mode<synchronous>, transform_indices = @transform_0, window_bounds = array<i64: 2, 128>}, {transform_indices = @transform_1, window_bounds = array<i64: 256, 128>}, {transform_indices = @transform_2, window_bounds = array<i64: 256, 128>}]} {
    %c0 = arith.constant 0 : index
    %c0_0 = arith.constant 0 : index
    %0 = vector.load %arg2[%c0, %c0_0] : memref<256x128xf32, #tpu.memory_space<vmem>>, vector<256x128xf32>
    %c0_1 = arith.constant 0 : index
    %c0_2 = arith.constant 0 : index
    %1 = vector.load %arg1[%c0_1, %c0_2] : memref<2x128xf32, #tpu.memory_space<vmem>>, vector<1x128xf32>
    %2 = vector.broadcast %1 : vector<1x128xf32> to vector<256x128xf32>
    %3 = arith.mulf %0, %2 : vector<256x128xf32>
    %c1 = arith.constant 1 : index
    %c0_3 = arith.constant 0 : index
    %4 = vector.load %arg1[%c1, %c0_3] : memref<2x128xf32, #tpu.memory_space<vmem>>, vector<1x128xf32>
    %5 = vector.broadcast %4 : vector<1x128xf32> to vector<256x128xf32>
    %6 = arith.addf %3, %5 : vector<256x128xf32>
    %c0_4 = arith.constant 0 : index
    %c0_5 = arith.constant 0 : index
    %7 = vector.load %arg3[%c0_4, %c0_5] : memref<256x128xf32, #tpu.memory_space<vmem>>, vector<256x128xf32>
    tpu.vector_store %arg3[%c0_4, %c0_5], %6 {strides = array<i32>} : memref<256x128xf32, #tpu.memory_space<vmem>>, vector<256x128xf32>,
    return
  }
  func.func @transform_0(%arg0: i32) -> (i32, i32) {
    %c0_i32 = arith.constant 0 : i32
    %c0_i32_0 = arith.constant 0 : i32
    %c0_i32_1 = arith.constant 0 : i32
    return %c0_i32, %c0_i32_0 : i32, i32
  }
  func.func @transform_1(%arg0: i32) -> (i32, i32) {
    %c0_i32 = arith.constant 0 : i32
    %c0_i32_0 = arith.constant 0 : i32
    return %arg0, %c0_i32 : i32, i32
  }
  func.func @transform_2(%arg0: i32) -> (i32, i32) {
    %c0_i32 = arith.constant 0 : i32
    %c0_i32_0 = arith.constant 0 : i32
    return %arg0, %c0_i32 : i32, i32
  }
}

</mosaic_0001>

<bundles_post_ra>
// kernel: relu_conv_bn.3
= control target key start
LH: loop header
LB: loop body
LE: loop exit
PB: predicated region body
PF: predicated region fallthrough
CT: control target
= control target key end

     0   :  { %s385_s9 = smov 0   ;;  %s551_s0 = inlined_call_operand.vmem [shape: f32[2,128], index: 0, kind: input, shape index: {}]   ;;  %s552_s1 = inlined_call_operand.vmem [shape: f32[512,128], index: 1, kind: input, shape index: {}, may-alias: {1,2}]   ;;  %s553_s2 = inlined_call_operand.vmem [shape: f32[512,128], index: 2, kind: output, shape index: {}, may-alias: {1,2}]  }
   0x1 LB: > { %s341_s10 = sadd.s32 4294967295, %s368_s9   ;;  %p345_p0 = scmp.ge.s32.totalorder %s368_s9, 1  ;;  %s368_s9 = sphi %s385_s9, %s12_s9  }
   0x2   : > { %p113_p1 = scmp.lt.s32.totalorder %s368_s9, 3 }
   0x4   : > { %p114_p2 = pnand %p345_p0, %p113_p1 }
   0x5   : > { %s346_s11 = sshll.u32 (!%p114_p2), %s341_s10, 5  ;;  %v399_v0 = vld [vmem:[%s551_s0] ss:$0 sm:$0xff] (!%p114_p2)  ;;  %v411_v1 = vld [vmem:[%s551_s0 + $0x1] ss:$0 sm:$0xff] (!%p114_p2) }
   0x6   : > { %117 = sbr.rel (%p114_p2) target bundleno = 43 (0x2b), region = 28  ;;  %p136_p3 = scmp.lt.s32.totalorder (!%p114_p2), %s346_s11, 63 }
   0xd   : > { %s555_s11 = smov (!%p136_p3, %s346_s11), 63 }
   0xe   : > { %s347_s12 = sshll.u32 %s555_s11, 3 }
   0xf   : > { %s406_s17 = scalar_lea.vmem %s552_s1, %s347_s12  ;;  %s467_s22 = scalar_lea.vmem %s553_s2, %s347_s12 }
  0x10   : > { %v147_v2 = vld [vmem:[%s406_s17] sm:$0xff]  ;;  %v148_v3 = vld [vmem:[%s406_s17 + $0x8] sm:$0xff]  ;;  %v149_v4 = vld [vmem:[%s406_s17 + $0x10] sm:$0xff] }
  0x11   : > { %v150_v5 = vld [vmem:[%s406_s17 + $0x18] sm:$0xff]  ;;  %v151_v6 = vld [vmem:[%s406_s17 + $0x20] sm:$0xff]  ;;  %v152_v7 = vld [vmem:[%s406_s17 + $0x28] sm:$0xff]  ;;  %v184_v8 = vmul.f32 %v399_v0, %v147_v2  ;;  %v185_v9 = vmul.f32 %v399_v0, %v148_v3  ;;  %v186_v10 = vmul.f32 %v399_v0, %v149_v4 }
  0x12   : > { %v153_v11 = vld [vmem:[%s406_s17 + $0x30] sm:$0xff]  ;;  %v154_v12 = vld [vmem:[%s406_s17 + $0x38] sm:$0xff]  ;;  %v155_v13 = vld [vmem:[%s406_s17 + $0x40] sm:$0xff]  ;;  %v187_v14 = vmul.f32 %v399_v0, %v150_v5  ;;  %v188_v15 = vmul.f32 %v399_v0, %v151_v6  ;;  %v189_v16 = vmul.f32 %v399_v0, %v152_v7 }
  0x13   : > { %v156_v17 = vld [vmem:[%s406_s17 + $0x48] sm:$0xff]  ;;  %v157_v18 = vld [vmem:[%s406_s17 + $0x50] sm:$0xff]  ;;  %v158_v19 = vld [vmem:[%s406_s17 + $0x58] sm:$0xff]  ;;  %v221_v20 = vadd.f32 %v411_v1, %v184_v8  ;;  %v222_v21 = vadd.f32 %v411_v1, %v185_v9  ;;  %v223_v22 = vadd.f32 %v411_v1, %v186_v10  ;;  %v190_v23 = vmul.f32 %v399_v0, %v153_v11 }
  0x14   : > { %v159_v24 = vld [vmem:[%s406_s17 + $0x60] sm:$0xff]  ;;  %v160_v25 = vld [vmem:[%s406_s17 + $0x68] sm:$0xff]  ;;  %v161_v26 = vld [vmem:[%s406_s17 + $0x70] sm:$0xff]  ;;  %v224_v27 = vadd.f32 %v411_v1, %v187_v14  ;;  %v225_v28 = vadd.f32 %v411_v1, %v188_v15  ;;  %v226_v29 = vadd.f32 %v411_v1, %v189_v16  ;;  %v191_v30 = vmul.f32 %v399_v0, %v154_v12 }
  0x15   : > { %v162_v31 = vld [vmem:[%s406_s17 + $0x78] sm:$0xff]  ;;  %v163_v32 = vld [vmem:[%s406_s17 + $0x80] sm:$0xff]  ;;  %v227_v33 = vadd.f32 %v411_v1, %v190_v23  ;;  %v192_v34 = vmul.f32 %v399_v0, %v155_v13  ;;  %v193_v35 = vmul.f32 %v399_v0, %v156_v17  ;;  %v194_v36 = vmul.f32 %v399_v0, %v157_v18  ;;  %v164_v37 = vld [vmem:[%s406_s17 + $0x88] sm:$0xff] }
  0x16   : > { %v165_v38 = vld [vmem:[%s406_s17 + $0x90] sm:$0xff]  ;;  %v166_v39 = vld [vmem:[%s406_s17 + $0x98] sm:$0xff]  ;;  %v228_v40 = vadd.f32 %v411_v1, %v191_v30  ;;  %v195_v41 = vmul.f32 %v399_v0, %v158_v19  ;;  %v196_v42 = vmul.f32 %v399_v0, %v159_v24  ;;  %v197_v43 = vmul.f32 %v399_v0, %v160_v25  ;;  %v167_v44 = vld [vmem:[%s406_s17 + $0xa0] sm:$0xff] }
  0x17   : > { %v168_v45 = vld [vmem:[%s406_s17 + $0xa8] sm:$0xff]  ;;  %v169_v46 = vld [vmem:[%s406_s17 + $0xb0] sm:$0xff]  ;;  %v229_v47 = vadd.f32 %v411_v1, %v192_v34  ;;  %v230_v48 = vadd.f32 %v411_v1, %v193_v35  ;;  %v231_v49 = vadd.f32 %v411_v1, %v194_v36  ;;  %v198_v50 = vmul.f32 %v399_v0, %v161_v26  ;;  %v170_v51 = vld [vmem:[%s406_s17 + $0xb8] sm:$0xff] }
  0x18   : > { %v171_v52 = vld [vmem:[%s406_s17 + $0xc0] sm:$0xff]  ;;  %v172_v53 = vld [vmem:[%s406_s17 + $0xc8] sm:$0xff]  ;;  %v232_v54 = vadd.f32 %v411_v1, %v195_v41  ;;  %v233_v55 = vadd.f32 %v411_v1, %v196_v42  ;;  %v234_v56 = vadd.f32 %v411_v1, %v197_v43  ;;  %v199_v57 = vmul.f32 %v399_v0, %v162_v31  ;;  %v173_v58 = vld [vmem:[%s406_s17 + $0xd0] sm:$0xff] }
  0x19   : > { %v174_v59 = vld [vmem:[%s406_s17 + $0xd8] sm:$0xff]  ;;  %v175_v60 = vld [vmem:[%s406_s17 + $0xe0] sm:$0xff]  ;;  %v235_v61 = vadd.f32 %v411_v1, %v198_v50  ;;  %v200_v62 = vmul.f32 %v399_v0, %v163_v32  ;;  %v201_v63 = vmul.f32 %v399_v0, %v164_v37  ;;  %v202_v2 = vmul.f32 %v399_v0, %v165_v38  ;;  %v176_v3 = vld [vmem:[%s406_s17 + $0xe8] sm:$0xff] }
  0x1a   : > { %v177_v4 = vld [vmem:[%s406_s17 + $0xf0] sm:$0xff]  ;;  %v178_v5 = vld [vmem:[%s406_s17 + $0xf8] sm:$0xff]  ;;  %v236_v6 = vadd.f32 %v411_v1, %v199_v57  ;;  %v203_v7 = vmul.f32 %v399_v0, %v166_v39  ;;  %v204_v8 = vmul.f32 %v399_v0, %v167_v44  ;;  %v205_v9 = vmul.f32 %v399_v0, %v168_v45 }
  0x1b   : > { %253 = vst [vmem:[%s467_s22] sm:$0xff] %v221_v20  ;;  %254 = vst [vmem:[%s467_s22 + $0x8] sm:$0xff] %v222_v21  ;;  %v237_v10 = vadd.f32 %v411_v1, %v200_v62  ;;  %v238_v11 = vadd.f32 %v411_v1, %v201_v63  ;;  %v239_v12 = vadd.f32 %v411_v1, %v202_v2 }
  0x1c   : > { %255 = vst [vmem:[%s467_s22 + $0x10] sm:$0xff] %v223_v22  ;;  %256 = vst [vmem:[%s467_s22 + $0x18] sm:$0xff] %v224_v27  ;;  %v206_v13 = vmul.f32 %v399_v0, %v169_v46  ;;  %v240_v14 = vadd.f32 %v411_v1, %v203_v7  ;;  %v241_v15 = vadd.f32 %v411_v1, %v204_v8 }
  0x1d   : > { %257 = vst [vmem:[%s467_s22 + $0x20] sm:$0xff] %v225_v28  ;;  %258 = vst [vmem:[%s467_s22 + $0x28] sm:$0xff] %v226_v29  ;;  %v242_v16 = vadd.f32 %v411_v1, %v205_v9  ;;  %v207_v17 = vmul.f32 %v399_v0, %v170_v51  ;;  %v208_v19 = vmul.f32 %v399_v0, %v171_v52 }
  0x1e   : > { %259 = vst [vmem:[%s467_s22 + $0x30] sm:$0xff] %v227_v33  ;;  %260 = vst [vmem:[%s467_s22 + $0x38] sm:$0xff] %v228_v40  ;;  %v243_v18 = vadd.f32 %v411_v1, %v206_v13  ;;  %v209_v20 = vmul.f32 %v399_v0, %v172_v53  ;;  %v210_v21 = vmul.f32 %v399_v0, %v173_v58 }
  0x1f   : > { %261 = vst [vmem:[%s467_s22 + $0x40] sm:$0xff] %v229_v47  ;;  %262 = vst [vmem:[%s467_s22 + $0x48] sm:$0xff] %v230_v48  ;;  %v244_v22 = vadd.f32 %v411_v1, %v207_v17  ;;  %v211_v23 = vmul.f32 %v399_v0, %v174_v59  ;;  %v212_v24 = vmul.f32 %v399_v0, %v175_v60 }
  0x20   : > { %263 = vst [vmem:[%s467_s22 + $0x50] sm:$0xff] %v231_v49  ;;  %264 = vst [vmem:[%s467_s22 + $0x58] sm:$0xff] %v232_v54  ;;  %v213_v25 = vmul.f32 %v399_v0, %v176_v3  ;;  %v245_v26 = vadd.f32 %v411_v1, %v208_v19  ;;  %v246_v27 = vadd.f32 %v411_v1, %v209_v20 }
  0x21   : > { %265 = vst [vmem:[%s467_s22 + $0x60] sm:$0xff] %v233_v55  ;;  %266 = vst [vmem:[%s467_s22 + $0x68] sm:$0xff] %v234_v56  ;;  %v247_v28 = vadd.f32 %v411_v1, %v210_v21  ;;  %v214_v29 = vmul.f32 %v399_v0, %v177_v4  ;;  %v248_v30 = vadd.f32 %v411_v1, %v211_v23 }
  0x22   : > { %267 = vst [vmem:[%s467_s22 + $0x70] sm:$0xff] %v235_v61  ;;  %268 = vst [vmem:[%s467_s22 + $0x78] sm:$0xff] %v236_v6  ;;  %v249_v31 = vadd.f32 %v411_v1, %v212_v24  ;;  %v250_v32 = vadd.f32 %v411_v1, %v213_v25  ;;  %v215_v33 = vmul.f32 %v399_v0, %v178_v5 }
  0x23   : > { %269 = vst [vmem:[%s467_s22 + $0x80] sm:$0xff] %v237_v10  ;;  %270 = vst [vmem:[%s467_s22 + $0x88] sm:$0xff] %v238_v11  ;;  %v251_v34 = vadd.f32 %v411_v1, %v214_v29 }
  0x24   : > { %271 = vst [vmem:[%s467_s22 + $0x90] sm:$0xff] %v239_v12  ;;  %272 = vst [vmem:[%s467_s22 + $0x98] sm:$0xff] %v240_v14  ;;  %v252_v35 = vadd.f32 %v411_v1, %v215_v33 }
  0x25   : > { %273 = vst [vmem:[%s467_s22 + $0xa0] sm:$0xff] %v241_v15  ;;  %274 = vst [vmem:[%s467_s22 + $0xa8] sm:$0xff] %v242_v16 }
  0x26   : > { %275 = vst [vmem:[%s467_s22 + $0xb0] sm:$0xff] %v243_v18  ;;  %276 = vst [vmem:[%s467_s22 + $0xb8] sm:$0xff] %v244_v22 }
  0x27   : > { %277 = vst [vmem:[%s467_s22 + $0xc0] sm:$0xff] %v245_v26  ;;  %278 = vst [vmem:[%s467_s22 + $0xc8] sm:$0xff] %v246_v27 }
  0x28   : > { %279 = vst [vmem:[%s467_s22 + $0xd0] sm:$0xff] %v247_v28  ;;  %280 = vst [vmem:[%s467_s22 + $0xd8] sm:$0xff] %v248_v30 }
  0x29   : > { %281 = vst [vmem:[%s467_s22 + $0xe0] sm:$0xff] %v249_v31  ;;  %282 = vst [vmem:[%s467_s22 + $0xe8] sm:$0xff] %v250_v32 }
  0x2a   : > { %283 = vst [vmem:[%s467_s22 + $0xf0] sm:$0xff] %v251_v34  ;;  %284 = vst [vmem:[%s467_s22 + $0xf8] sm:$0xff] %v252_v35 }
  0x2b PF: > { %s12_s9 = sadd.s32 1, %s368_s9  }
  0x2c   : > { %p9_p4 = scmp.ge.s32.totalorder %s12_s9, 4  }
  0x2e   :  { %11 = sbr.rel (!%p9_p4) target bundleno = 1 (0x1), region = 58 }

// kernel: relu_conv_bn.2
= control target key start
LH: loop header
LB: loop body
LE: loop exit
PB: predicated region body
PF: predicated region fallthrough
CT: control target
= control target key end

     0   :  { %s942_s12 = smov 0   ;;  %s1168_s0 = inlined_call_operand.vmem [shape: f32[512,128], index: 0, kind: input, shape index: {}]   ;;  %s1169_s1 = inlined_call_operand.vmem [shape: f32[128,128], index: 1, kind: input, shape index: {}]   ;;  %s1170_s2 = inlined_call_operand.vmem [shape: f32[512,128], index: 2, kind: output, shape index: {0}]   ;;  %s1171_s3 = inlined_call_operand.vmem [shape: f32[2,2,128], index: 3, kind: output, shape index: {1}]  }
   0x1 LB: > { %s948_s13 = sadd.s32 4294967295, %s920_s12   ;;  %p722_p0 = scmp.ge.s32.totalorder %s920_s12, 1  ;;  %s920_s12 = sphi %s942_s12, %s14_s12  }
   0x2   : > { %p141_p1 = scmp.lt.s32.totalorder %s920_s12, 3 }
   0x4   : > { %p142_p2 = pnand %p722_p0, %p141_p1 }
   0x5   : > { %v249_v0 = vld [vmem:[%s1169_s1] sm:$0xff] (!%p142_p2)  ;;  %v250_v1 = vld [vmem:[%s1169_s1 + $0x8] sm:$0xff] (!%p142_p2)  ;;  %v251_v2 = vld [vmem:[%s1169_s1 + $0x10] sm:$0xff] (!%p142_p2)  ;;  %s723_s20 = sshll.u32 (!%p142_p2), %s948_s13, 5  ;;  %p181_p4 = scmp.lt.s32.totalorder (!%p142_p2), %s948_s13, 1  ;;  %vm628_vm0 = vcmask (!%p142_p2), 1040384  }
   0x6   : > { %145 = sbr.rel (%p142_p2) target bundleno = 333 (0x14d), region = 28  ;;  %v858_v3 = vpack.c.bf16 (!%p142_p2), %v250_v1, %v249_v0  ;;  %v252_v4 = vld [vmem:[%s1169_s1 + $0x18] sm:$0xff] (!%p142_p2)  ;;  %p170_p3 = scmp.lt.s32.totalorder (!%p142_p2), %s723_s20, 63  ;;  %v253_v6 = vld [vmem:[%s1169_s1 + $0x20] sm:$0xff] (!%p142_p2)  ;;  %v254_v7 = vld [vmem:[%s1169_s1 + $0x28] sm:$0xff] (!%p142_p2) }
   0x7   : > { %v862_v5 = vpack.c.bf16 (!%p142_p2), %v252_v4, %v251_v2  ;;  %v866_v8 = vpack.c.bf16 (!%p142_p2), %v254_v7, %v253_v6  ;;  %v255_v9 = vld [vmem:[%s1169_s1 + $0x30] sm:$0xff] (!%p142_p2)  ;;  %v256_v10 = vld [vmem:[%s1169_s1 + $0x38] sm:$0xff] (!%p142_p2)  ;;  %v257_v14 = vld [vmem:[%s1169_s1 + $0x40] sm:$0xff] (!%p142_p2) }
   0x8   : > { %859 = vmatprep.subr.bf16.mxu0 (!%p142_p2), %v858_v3  ;;  %890 = vmatprep.subr.bf16.mxu1 (!%p142_p2), %v858_v3  ;;  %v870_v13 = vpack.c.bf16 (!%p142_p2), %v256_v10, %v255_v9  ;;  %v258_v15 = vld [vmem:[%s1169_s1 + $0x48] sm:$0xff] (!%p142_p2)  ;;  %v259_v19 = vld [vmem:[%s1169_s1 + $0x50] sm:$0xff] (!%p142_p2)  ;;  %v260_v20 = vld [vmem:[%s1169_s1 + $0x58] sm:$0xff] (!%p142_p2) }
   0x9   : > { %861 = vmatpush3.bf16.msra.mxu0 (!%p142_p2), %v858_v3  ;;  %898 = vmatpush3.bf16.msra.mxu1 (!%p142_p2), %v858_v3  ;;  %v874_v17 = vpack.c.bf16 (!%p142_p2), %v258_v15, %v257_v14  ;;  %v878_v21 = vpack.c.bf16 (!%p142_p2), %v260_v20, %v259_v19  ;;  %v261_v22 = vld [vmem:[%s1169_s1 + $0x60] sm:$0xff] (!%p142_p2)  ;;  %v262_v23 = vld [vmem:[%s1169_s1 + $0x68] sm:$0xff] (!%p142_p2)  ;;  %v263_v25 = vld [vmem:[%s1169_s1 + $0x70] sm:$0xff] (!%p142_p2) }
   0xa   : > { %863 = vmatprep.subr.bf16.mxu0 (!%p142_p2), %v862_v5  ;;  %891 = vmatprep.subr.bf16.mxu1 (!%p142_p2), %v862_v5  ;;  %v882_v24 = vpack.c.bf16 (!%p142_p2), %v262_v23, %v261_v22  ;;  %v264_v26 = vld [vmem:[%s1169_s1 + $0x78] sm:$0xff] (!%p142_p2) }
   0xb   : > { %v886_v27 = vpack.c.bf16 (!%p142_p2), %v264_v26, %v263_v25 }
   0xd   : > { %s1173_s20 = smov (!%p170_p3, %s723_s20), 63  ;;  %865 = vmatpush3.bf16.msra.mxu0 %v862_v5  ;;  %899 = vmatpush3.bf16.msra.mxu1 %v862_v5  ;;  %s1175_s13 = smov (!%p181_p4, %s948_s13), 1 }
   0xe   : > { %s724_s27 = sshll.u32 %s1173_s20, 3  ;;  %867 = vmatprep.subr.bf16.mxu0 %v866_v8  ;;  %892 = vmatprep.subr.bf16.mxu1 %v866_v8  ;;  %s727_s20 = sshll.u32 %s1175_s13, 1 }
   0xf   : > { %s985_s7 = scalar_lea.vmem %s1168_s0, %s724_s27  ;;  %s1048_s30 = scalar_lea.vmem %s1170_s2, %s724_s27 }
  0x10   : > { %v185_v11 = vld [vmem:[%s985_s7] sm:$0xff]  ;;  %v186_v28 = vld [vmem:[%s985_s7 + $0x8] sm:$0xff]  ;;  %v187_v30 = vld [vmem:[%s985_s7 + $0x10] sm:$0xff]  ;;  %s184_s5 = scalar_lea.vmem %s1171_s3, %s727_s20 }
  0x11   : > { %v217_v12 = vmax.f32 %v185_v11, 0.0  ;;  %869 = vmatpush3.bf16.msra.mxu0 %v866_v8  ;;  %900 = vmatpush3.bf16.msra.mxu1 %v866_v8  ;;  %v201_v16 = vld [vmem:[%s985_s7 + $0x80] sm:$0xff]  ;;  %v202_v29 = vld [vmem:[%s985_s7 + $0x88] sm:$0xff]  ;;  %v203_v31 = vld [vmem:[%s985_s7 + $0x90] sm:$0xff]  ;;  %v218_v32 = vmax.f32 %v186_v28, 0.0  ;;  %v219_v34 = vmax.f32 %v187_v30, 0.0 }
  0x12   : > { %871 = vmatprep.subr.bf16.mxu0 %v870_v13  ;;  %893 = vmatprep.subr.bf16.mxu1 %v870_v13  ;;  %v233_v18 = vmax.f32 %v201_v16, 0.0  ;;  %v234_v33 = vmax.f32 %v202_v29, 0.0  ;;  %v188_v35 = vld [vmem:[%s985_s7 + $0x18] sm:$0xff]  ;;  %v235_v36 = vmax.f32 %v203_v31, 0.0  ;;  %v189_v38 = vld [vmem:[%s985_s7 + $0x20] sm:$0xff]  ;;  %v190_v43 = vld [vmem:[%s985_s7 + $0x28] sm:$0xff] }
  0x13   : > { %810 = vmatprep.mubr.f32.mxu0 %v217_v12  ;;  %v204_v37 = vld [vmem:[%s985_s7 + $0x98] sm:$0xff]  ;;  %v205_v39 = vld [vmem:[%s985_s7 + $0xa0] sm:$0xff]  ;;  %v220_v40 = vmax.f32 %v188_v35, 0.0  ;;  %v221_v42 = vmax.f32 %v189_v38, 0.0  ;;  %v206_v45 = vld [vmem:[%s985_s7 + $0xa8] sm:$0xff]  ;;  %v222_v48 = vmax.f32 %v190_v43, 0.0 }
  0x14   : > { %834 = vmatprep.mubr.f32.mxu1 %v233_v18  ;;  %v236_v41 = vmax.f32 %v204_v37, 0.0  ;;  %v237_v44 = vmax.f32 %v205_v39, 0.0  ;;  %v191_v46 = vld [vmem:[%s985_s7 + $0x30] sm:$0xff]  ;;  %v238_v49 = vmax.f32 %v206_v45, 0.0  ;;  %v192_v51 = vld [vmem:[%s985_s7 + $0x38] sm:$0xff]  ;;  %v193_v54 = vld [vmem:[%s985_s7 + $0x40] sm:$0xff] }
  0x15   : > { %873 = vmatpush3.bf16.msra.mxu0 %v870_v13  ;;  %901 = vmatpush3.bf16.msra.mxu1 %v870_v13  ;;  %v207_v47 = vld [vmem:[%s985_s7 + $0xb0] sm:$0xff]  ;;  %v223_v50 = vmax.f32 %v191_v46, 0.0  ;;  %v208_v53 = vld [vmem:[%s985_s7 + $0xb8] sm:$0xff]  ;;  %v209_v55 = vld [vmem:[%s985_s7 + $0xc0] sm:$0xff]  ;;  %v224_v56 = vmax.f32 %v192_v51, 0.0  ;;  %v225_v58 = vmax.f32 %v193_v54, 0.0 }
  0x16   : > { %875 = vmatprep.subr.bf16.mxu0 %v874_v17  ;;  %894 = vmatprep.subr.bf16.mxu1 %v874_v17  ;;  %v239_v52 = vmax.f32 %v207_v47, 0.0  ;;  %v240_v57 = vmax.f32 %v208_v53, 0.0  ;;  %v194_v59 = vld [vmem:[%s985_s7 + $0x48] sm:$0xff]  ;;  %v241_v60 = vmax.f32 %v209_v55, 0.0  ;;  %v195_v62 = vld [vmem:[%s985_s7 + $0x50] sm:$0xff]  ;;  %v196_v3 = vld [vmem:[%s985_s7 + $0x58] sm:$0xff] }
  0x17   : > { %v210_v61 = vld [vmem:[%s985_s7 + $0xc8] sm:$0xff]  ;;  %v211_v63 = vld [vmem:[%s985_s7 + $0xd0] sm:$0xff]  ;;  %v226_v0 = vmax.f32 %v194_v59, 0.0  ;;  %v227_v2 = vmax.f32 %v195_v62, 0.0  ;;  %v212_v5 = vld [vmem:[%s985_s7 + $0xd8] sm:$0xff]  ;;  %v228_v8 = vmax.f32 %v196_v3, 0.0 }
  0x18   : > { %v242_v1 = vmax.f32 %v210_v61, 0.0  ;;  %v243_v4 = vmax.f32 %v211_v63, 0.0  ;;  %v197_v6 = vld [vmem:[%s985_s7 + $0x60] sm:$0xff]  ;;  %v244_v9 = vmax.f32 %v212_v5, 0.0  ;;  %v198_v11 = vld [vmem:[%s985_s7 + $0x68] sm:$0xff]  ;;  %v199_v14 = vld [vmem:[%s985_s7 + $0x70] sm:$0xff] }
  0x19   : > { %877 = vmatpush3.bf16.msra.mxu0 %v874_v17  ;;  %902 = vmatpush3.bf16.msra.mxu1 %v874_v17  ;;  %v213_v7 = vld [vmem:[%s985_s7 + $0xe0] sm:$0xff]  ;;  %v229_v10 = vmax.f32 %v197_v6, 0.0  ;;  %v214_v13 = vld [vmem:[%s985_s7 + $0xe8] sm:$0xff]  ;;  %v215_v15 = vld [vmem:[%s985_s7 + $0xf0] sm:$0xff]  ;;  %v230_v16 = vmax.f32 %v198_v11, 0.0  ;;  %v231_v18 = vmax.f32 %v199_v14, 0.0 }
  0x1a   : > { %879 = vmatprep.subr.bf16.mxu0 %v878_v21  ;;  %895 = vmatprep.subr.bf16.mxu1 %v878_v21  ;;  %v245_v12 = vmax.f32 %v213_v7, 0.0  ;;  %v246_v17 = vmax.f32 %v214_v13, 0.0  ;;  %v200_v19 = vld [vmem:[%s985_s7 + $0x78] sm:$0xff]  ;;  %v247_v20 = vmax.f32 %v215_v15, 0.0 }
  0x1b   : > { %v232_v22 = vmax.f32 %v200_v19, 0.0 }
  0x1d   : > { %881 = vmatpush3.bf16.msra.mxu0 %v878_v21  ;;  %903 = vmatpush3.bf16.msra.mxu1 %v878_v21  ;;  %v216_v21 = vld [vmem:[%s985_s7 + $0xf8] sm:$0xff] }
  0x1e   : > { %883 = vmatprep.subr.bf16.mxu0 %v882_v24  ;;  %896 = vmatprep.subr.bf16.mxu1 %v882_v24  ;;  %v248_v23 = vmax.f32 %v216_v21, 0.0 }
  0x21   : > { %885 = vmatpush3.bf16.msra.mxu0 %v882_v24  ;;  %904 = vmatpush3.bf16.msra.mxu1 %v882_v24 }
  0x22   : > { %887 = vmatprep.subr.bf16.mxu0 %v886_v27  ;;  %897 = vmatprep.subr.bf16.mxu1 %v886_v27 }
  0x25   : > { %889 = vmatpush3.bf16.msra.mxu0 %v886_v27  ;;  %905 = vmatpush3.bf16.msra.mxu1 %v886_v27 }
  0x28   : > { %811 = vmatmul.mubr.f32.vlgmr.msra.gmra.mrb[0].mxu0 %v218_v32  ;;  %835 = vmatmul.mubr.f32.vlgmr.msra.gmra.mrb[0].mxu1 %v234_v33 }
  0x29   : > { %813 = vmatprep.mubr.f32.mxu0 %v219_v34  ;;  %837 = vmatprep.mubr.f32.mxu1 %v235_v36 }
  0x2c   : > { %814 = vmatmul.mubr.f32.gmra.mrb[2].mxu0 %v220_v40  ;;  %838 = vmatmul.mubr.f32.gmra.mrb[2].mxu1 %v236_v41 }
  0x2d   : > { %816 = vmatprep.mubr.f32.mxu0 %v221_v42  ;;  %840 = vmatprep.mubr.f32.mxu1 %v237_v44 }
  0x30   : > { %817 = vmatmul.mubr.f32.gmra.mrb[4].mxu0 %v222_v48  ;;  %841 = vmatmul.mubr.f32.gmra.mrb[4].mxu1 %v238_v49 }
  0x31   : > { %819 = vmatprep.mubr.f32.mxu0 %v223_v50  ;;  %843 = vmatprep.mubr.f32.mxu1 %v239_v52 }
  0x34   : > { %820 = vmatmul.mubr.f32.gmra.mrb[6].mxu0 %v224_v56  ;;  %844 = vmatmul.mubr.f32.gmra.mrb[6].mxu1 %v240_v57 }
  0x35   : > { %822 = vmatprep.mubr.f32.mxu0 %v225_v58  ;;  %846 = vmatprep.mubr.f32.mxu1 %v241_v60 }
  0x38   : > { %823 = vmatmul.mubr.f32.gmra.mrb[8].mxu0 %v226_v0  ;;  %847 = vmatmul.mubr.f32.gmra.mrb[8].mxu1 %v242_v1 }
  0x39   : > { %825 = vmatprep.mubr.f32.mxu0 %v227_v2  ;;  %849 = vmatprep.mubr.f32.mxu1 %v243_v4 }
  0x3c   : > { %826 = vmatmul.mubr.f32.gmra.mrb[10].mxu0 %v228_v8  ;;  %850 = vmatmul.mubr.f32.gmra.mrb[10].mxu1 %v244_v9 }
  0x3d   : > { %828 = vmatprep.mubr.f32.mxu0 %v229_v10  ;;  %852 = vmatprep.mubr.f32.mxu1 %v245_v12 }
  0x40   : > { %829 = vmatmul.mubr.f32.gmra.mrb[12].mxu0 %v230_v16  ;;  %853 = vmatmul.mubr.f32.gmra.mrb[12].mxu1 %v246_v17 }
  0x41   : > { %831 = vmatprep.mubr.f32.mxu0 %v231_v18  ;;  %855 = vmatprep.mubr.f32.mxu1 %v247_v20 }
  0x44   : > { %832 = vmatmul.mubr.f32.gmra.mrb[14].mxu0 %v232_v22  ;;  %856 = vmatmul.mubr.f32.gmra.mrb[14].mxu1 %v248_v23 }
  0xfb   : > { %v812_v24 = vpop.f32.mrb[0].mxu0  ;;  %v1050_v25 = vpop.f32.mrb[0].mxu1 }
  0xfc   : > { %491 = vst [vmem:[%s1048_s30 + $0x8] sm:$0xff] %v812_v24  ;;  %v560_v26 = vmul.f32 %v812_v24, %v812_v24  ;;  %v331_v27 = vpop.f32.mrb[1].mxu0  ;;  %507 = vst [vmem:[%s1048_s30 + $0x88] sm:$0xff] %v1050_v25  ;;  %v1055_v28 = vpop.f32.mrb[1].mxu1 }
  0xfd   : > { %490 = vst [vmem:[%s1048_s30] sm:$0xff] %v331_v27  ;;  %v522_v29 = vadd.f32 %v812_v24, %v331_v27  ;;  %v559_v30 = vmul.f32 %v331_v27, %v331_v27  ;;  %506 = vst [vmem:[%s1048_s30 + $0x80] sm:$0xff] %v1055_v28 }
  0xff   : > { %v591_v31 = vadd.f32 %v560_v26, %v559_v30  ;;  %v815_v32 = vpop.f32.mrb[2].mxu0  ;;  %v1060_v33 = vpop.f32.mrb[2].mxu1 }
 0x100   : > { %493 = vst [vmem:[%s1048_s30 + $0x18] sm:$0xff] %v815_v32  ;;  %v341_v34 = vpop.f32.mrb[3].mxu0  ;;  %509 = vst [vmem:[%s1048_s30 + $0x98] sm:$0xff] %v1060_v33  ;;  %v1065_v35 = vpop.f32.mrb[3].mxu1  ;;  %v562_v38 = vmul.f32 %v815_v32, %v815_v32 }
 0x101   : > { %492 = vst [vmem:[%s1048_s30 + $0x10] sm:$0xff] %v341_v34  ;;  %v523_v36 = vadd.f32 %v522_v29, %v341_v34  ;;  %v561_v37 = vmul.f32 %v341_v34, %v341_v34  ;;  %508 = vst [vmem:[%s1048_s30 + $0x90] sm:$0xff] %v1065_v35 }
 0x103   : > { %v592_v39 = vadd.f32 %v591_v31, %v561_v37  ;;  %v818_v40 = vpop.f32.mrb[4].mxu0  ;;  %v524_v41 = vadd.f32 %v815_v32, %v523_v36  ;;  %v1070_v42 = vpop.f32.mrb[4].mxu1 }
 0x104   : > { %495 = vst [vmem:[%s1048_s30 + $0x28] sm:$0xff] %v818_v40  ;;  %v351_v43 = vpop.f32.mrb[5].mxu0  ;;  %511 = vst [vmem:[%s1048_s30 + $0xa8] sm:$0xff] %v1070_v42  ;;  %v1075_v44 = vpop.f32.mrb[5].mxu1  ;;  %v564_v48 = vmul.f32 %v818_v40, %v818_v40 }
 0x105   : > { %494 = vst [vmem:[%s1048_s30 + $0x20] sm:$0xff] %v351_v43  ;;  %v525_v45 = vadd.f32 %v524_v41, %v351_v43  ;;  %v563_v46 = vmul.f32 %v351_v43, %v351_v43  ;;  %v593_v47 = vadd.f32 %v592_v39, %v562_v38  ;;  %510 = vst [vmem:[%s1048_s30 + $0xa0] sm:$0xff] %v1075_v44 }
 0x106   : > { %v575_v41 = vmul.f32 %v1055_v28, %v1055_v28 }
 0x107   : > { %v594_v49 = vadd.f32 %v593_v47, %v563_v46  ;;  %v821_v50 = vpop.f32.mrb[6].mxu0  ;;  %v526_v51 = vadd.f32 %v818_v40, %v525_v45  ;;  %v1080_v52 = vpop.f32.mrb[6].mxu1  ;;  %v576_v46 = vmul.f32 %v1050_v25, %v1050_v25 }
 0x108   : > { %497 = vst [vmem:[%s1048_s30 + $0x38] sm:$0xff] %v821_v50  ;;  %v361_v53 = vpop.f32.mrb[7].mxu0  ;;  %513 = vst [vmem:[%s1048_s30 + $0xb8] sm:$0xff] %v1080_v52  ;;  %v1085_v54 = vpop.f32.mrb[7].mxu1  ;;  %v566_v58 = vmul.f32 %v821_v50, %v821_v50 }
 0x109   : > { %496 = vst [vmem:[%s1048_s30 + $0x30] sm:$0xff] %v361_v53  ;;  %v527_v55 = vadd.f32 %v526_v51, %v361_v53  ;;  %v565_v56 = vmul.f32 %v361_v53, %v361_v53  ;;  %v595_v57 = vadd.f32 %v594_v49, %v564_v48  ;;  %512 = vst [vmem:[%s1048_s30 + $0xb0] sm:$0xff] %v1085_v54 }
 0x10a   : > { %v577_v49 = vmul.f32 %v1065_v35, %v1065_v35  ;;  %v578_v53 = vmul.f32 %v1060_v33, %v1060_v33 }
 0x10b   : > { %v596_v59 = vadd.f32 %v595_v57, %v565_v56  ;;  %v824_v60 = vpop.f32.mrb[8].mxu0  ;;  %v528_v61 = vadd.f32 %v821_v50, %v527_v55  ;;  %v1090_v62 = vpop.f32.mrb[8].mxu1 }
 0x10c   : > { %499 = vst [vmem:[%s1048_s30 + $0x48] sm:$0xff] %v824_v60  ;;  %v371_v63 = vpop.f32.mrb[9].mxu0  ;;  %515 = vst [vmem:[%s1048_s30 + $0xc8] sm:$0xff] %v1090_v62  ;;  %v1095_v0 = vpop.f32.mrb[9].mxu1  ;;  %v568_v4 = vmul.f32 %v824_v60, %v824_v60 }
 0x10d   : > { %498 = vst [vmem:[%s1048_s30 + $0x40] sm:$0xff] %v371_v63  ;;  %v529_v1 = vadd.f32 %v528_v61, %v371_v63  ;;  %v567_v2 = vmul.f32 %v371_v63, %v371_v63  ;;  %v597_v3 = vadd.f32 %v596_v59, %v566_v58  ;;  %514 = vst [vmem:[%s1048_s30 + $0xc0] sm:$0xff] %v1095_v0 }
 0x10f   : > { %v598_v5 = vadd.f32 %v597_v3, %v567_v2  ;;  %v827_v6 = vpop.f32.mrb[10].mxu0  ;;  %v530_v7 = vadd.f32 %v824_v60, %v529_v1  ;;  %v1100_v8 = vpop.f32.mrb[10].mxu1 }
 0x110   : > { %501 = vst [vmem:[%s1048_s30 + $0x58] sm:$0xff] %v827_v6  ;;  %v381_v9 = vpop.f32.mrb[11].mxu0  ;;  %517 = vst [vmem:[%s1048_s30 + $0xd8] sm:$0xff] %v1100_v8  ;;  %v1105_v10 = vpop.f32.mrb[11].mxu1  ;;  %v570_v14 = vmul.f32 %v827_v6, %v827_v6 }
 0x111   : > { %500 = vst [vmem:[%s1048_s30 + $0x50] sm:$0xff] %v381_v9  ;;  %v531_v11 = vadd.f32 %v530_v7, %v381_v9  ;;  %v569_v12 = vmul.f32 %v381_v9, %v381_v9  ;;  %v599_v13 = vadd.f32 %v598_v5, %v568_v4  ;;  %516 = vst [vmem:[%s1048_s30 + $0xd0] sm:$0xff] %v1105_v10 }
 0x113   : > { %v600_v15 = vadd.f32 %v599_v13, %v569_v12  ;;  %v830_v16 = vpop.f32.mrb[12].mxu0  ;;  %v532_v17 = vadd.f32 %v827_v6, %v531_v11  ;;  %v1110_v18 = vpop.f32.mrb[12].mxu1 }
 0x114   : > { %503 = vst [vmem:[%s1048_s30 + $0x68] sm:$0xff] %v830_v16  ;;  %v391_v19 = vpop.f32.mrb[13].mxu0  ;;  %519 = vst [vmem:[%s1048_s30 + $0xe8] sm:$0xff] %v1110_v18  ;;  %v471_v20 = vpop.f32.mrb[13].mxu1  ;;  %v572_v24 = vmul.f32 %v830_v16, %v830_v16 }
 0x115   : > { %502 = vst [vmem:[%s1048_s30 + $0x60] sm:$0xff] %v391_v19  ;;  %v533_v21 = vadd.f32 %v532_v17, %v391_v19  ;;  %v571_v22 = vmul.f32 %v391_v19, %v391_v19  ;;  %v601_v23 = vadd.f32 %v600_v15, %v570_v14  ;;  %518 = vst [vmem:[%s1048_s30 + $0xe0] sm:$0xff] %v471_v20 }
 0x116   : > { %v587_v12 = vmul.f32 %v471_v20, %v471_v20  ;;  %v588_v15 = vmul.f32 %v1110_v18, %v1110_v18 }
 0x117   : > { %v602_v26 = vadd.f32 %v601_v23, %v571_v22  ;;  %v833_v27 = vpop.f32.mrb[14].mxu0  ;;  %v534_v29 = vadd.f32 %v830_v16, %v533_v21  ;;  %v857_v30 = vpop.f32.mrb[14].mxu1 }
 0x118   : > { %505 = vst [vmem:[%s1048_s30 + $0x78] sm:$0xff] %v833_v27  ;;  %v401_v31 = vpop.f32.mrb[15].mxu0  ;;  %521 = vst [vmem:[%s1048_s30 + $0xf8] sm:$0xff] %v857_v30  ;;  %v481_v32 = vpop.f32.mrb[15].mxu1  ;;  %v574_v38 = vmul.f32 %v833_v27, %v833_v27  ;;  %v590_v21 = vmul.f32 %v857_v30, %v857_v30 }
 0x119   : > { %504 = vst [vmem:[%s1048_s30 + $0x70] sm:$0xff] %v401_v31  ;;  %v535_v34 = vadd.f32 %v534_v29, %v401_v31  ;;  %v573_v36 = vmul.f32 %v401_v31, %v401_v31  ;;  %v603_v37 = vadd.f32 %v602_v26, %v572_v24  ;;  %520 = vst [vmem:[%s1048_s30 + $0xf0] sm:$0xff] %v481_v32 }
 0x11a   : > { %v589_v17 = vmul.f32 %v481_v32, %v481_v32 }
 0x11b   : > { %v536_v39 = vadd.f32 %v833_v27, %v535_v34  ;;  %v604_v40 = vadd.f32 %v603_v37, %v573_v36 }
 0x11d   : > { %v605_v43 = vadd.f32 %v604_v40, %v574_v38  ;;  %v537_v45 = vadd.f32 %v536_v39, %v1055_v28  ;;  %v579_v28 = vmul.f32 %v1075_v44, %v1075_v44 }
 0x11f   : > { %v606_v47 = vadd.f32 %v605_v43, %v575_v41  ;;  %v538_v48 = vadd.f32 %v1050_v25, %v537_v45  ;;  %v580_v25 = vmul.f32 %v1070_v42, %v1070_v42 }
 0x121   : > { %v539_v50 = vadd.f32 %v538_v48, %v1065_v35  ;;  %v607_v51 = vadd.f32 %v606_v47, %v576_v46  ;;  %v581_v35 = vmul.f32 %v1085_v54, %v1085_v54 }
 0x123   : > { %v608_v55 = vadd.f32 %v607_v51, %v577_v49  ;;  %v540_v56 = vadd.f32 %v1060_v33, %v539_v50  ;;  %v582_v33 = vmul.f32 %v1080_v52, %v1080_v52 }
 0x125   : > { %v541_v57 = vadd.f32 %v540_v56, %v1075_v44  ;;  %v609_v58 = vadd.f32 %v608_v55, %v578_v53  ;;  %v583_v44 = vmul.f32 %v1095_v0, %v1095_v0 }
 0x127   : > { %v610_v59 = vadd.f32 %v609_v58, %v579_v28  ;;  %v542_v60 = vadd.f32 %v1070_v42, %v541_v57  ;;  %v584_v42 = vmul.f32 %v1090_v62, %v1090_v62 }
 0x129   : > { %v543_v61 = vadd.f32 %v542_v60, %v1085_v54  ;;  %v611_v63 = vadd.f32 %v610_v59, %v580_v25  ;;  %v585_v54 = vmul.f32 %v1105_v10, %v1105_v10 }
 0x12b   : > { %v612_v1 = vadd.f32 %v611_v63, %v581_v35  ;;  %v544_v2 = vadd.f32 %v1080_v52, %v543_v61  ;;  %v586_v52 = vmul.f32 %v1100_v8, %v1100_v8 }
 0x12d   : > { %v545_v3 = vadd.f32 %v544_v2, %v1095_v0  ;;  %v613_v4 = vadd.f32 %v612_v1, %v582_v33 }
 0x12f   : > { %v614_v5 = vadd.f32 %v613_v4, %v583_v44  ;;  %v546_v6 = vadd.f32 %v1090_v62, %v545_v3 }
 0x131   : > { %v547_v7 = vadd.f32 %v546_v6, %v1105_v10  ;;  %v615_v9 = vadd.f32 %v614_v5, %v584_v42 }
 0x133   : > { %v616_v11 = vadd.f32 %v615_v9, %v585_v54  ;;  %v548_v0 = vadd.f32 %v1100_v8, %v547_v7 }
 0x135   : > { %v549_v13 = vadd.f32 %v548_v0, %v471_v20  ;;  %v617_v14 = vadd.f32 %v616_v11, %v586_v52 }
 0x137   : > { %v618_v62 = vadd.f32 %v617_v14, %v587_v12  ;;  %v550_v16 = vadd.f32 %v1110_v18, %v549_v13 }
 0x139   : > { %v551_v10 = vadd.f32 %v550_v16, %v481_v32  ;;  %v619_v19 = vadd.f32 %v618_v62, %v588_v15 }
 0x13b   : > { %v552_v22 = vadd.f32 %v857_v30, %v551_v10  ;;  %v620_v23 = vadd.f32 %v619_v19, %v589_v17 }
 0x13d   : > { %v553_v24 = vrot.slane %v552_v22, 4  ;;  %v621_v26 = vadd.f32 %v620_v23, %v590_v21 }
 0x13f   : > { %v554_v8 = vadd.f32 %v553_v24, %v552_v22  ;;  %v622_v27 = vrot.slane %v621_v26, 4 }
 0x141   : > { %v555_v20 = vrot.slane %v554_v8, 2  ;;  %v623_v29 = vadd.f32 %v622_v27, %v621_v26 }
 0x143   : > { %v556_v31 = vadd.f32 %v555_v20, %v554_v8  ;;  %v624_v34 = vrot.slane %v623_v29, 2 }
 0x145   : > { %v557_v36 = vrot.slane %v556_v31, 1  ;;  %v625_v37 = vadd.f32 %v624_v34, %v623_v29 }
 0x147   : > { %v626_v18 = vrot.slane %v625_v37, 1  ;;  %v558_v30 = vadd.f32 %v557_v36, %v556_v31 }
 0x149   : > { %v627_v32 = vadd.f32 %v626_v18, %v625_v37 }
 0x14b   : > { %v629_v38 = vsel %vm628_vm0, %v558_v30, %v627_v32 }
 0x14c   : > { %630 = vst [vmem:[%s184_s5] sm:$0x3] %v629_v38 }
 0x14d PF: > { %s14_s12 = sadd.s32 1, %s920_s12  }
 0x14e   : > { %p11_p5 = scmp.ge.s32.totalorder %s14_s12, 4  }
 0x150   :  { %13 = sbr.rel (!%p11_p5) target bundleno = 1 (0x1), region = 70 }

</bundles_post_ra>
